<compile_context>
chip_gen: v6e
topology: v6e:2x2x1
jax: 0.10.0
libtpu: 0.0.40
codegen_flags: <defaults>
</compile_context>

<pallas_src>
import functools

import jax
import jax.numpy as jnp
from jax.experimental import pallas as pl
from jax.experimental.pallas import tpu as pltpu


def _round_up(x, m):
    return (x + m - 1) // m * m


def mlp_kernel(x_ref, w1_ref, b1_ref, w2_ref, b2_ref, o_ref):
    # One fused pass per batch tile: (x @ W1 + b1) -> ReLU -> (@ W2 + b2).
    x = x_ref[...]                                                  # (tb, Dp)
    h = jnp.dot(x, w1_ref[...], preferred_element_type=jnp.float32)
    h = jnp.maximum(h + b1_ref[...], 0.0)                           # (tb, Hp) f32
    out = jnp.dot(h.astype(w2_ref.dtype), w2_ref[...],
                  preferred_element_type=jnp.float32)
    o_ref[...] = (out + b2_ref[...]).astype(o_ref.dtype)            # (tb, Cp) lane-dense


def _pick_tb(B, Dp, Hp, Cp, in_bytes, sublane, budget=24 * 1024 * 1024):
    """Largest batch tile (<=512 rows) whose residency fits the VMEM budget."""
    # Resident weights/biases (worst case: double-buffered by the pipeline).
    weight_bytes = 2 * ((Dp * Hp + Hp * Cp) * in_bytes + (Hp + Cp) * 4)
    tb = 512
    while tb > sublane:
        tile_bytes = 2 * tb * Dp * in_bytes + 2 * tb * Cp * 4 + tb * Hp * 4
        if weight_bytes + tile_bytes <= budget:
            break
        tb //= 2
    tb = max(tb, sublane)
    tb = min(tb, _round_up(B, sublane))       # never bigger than the (padded) batch
    return tb


@functools.partial(jax.jit, static_argnames=("compute_dtype",))
def mlp_forward(x, w1, b1, w2, b2, *, compute_dtype=jnp.bfloat16):
    """x: (B, D); w1: (H, D) PyTorch layout; b1: (H,); w2: (C, H); b2: (C,)."""
    B, D = x.shape
    H = w1.shape[0]
    C = w2.shape[0]

    in_bytes = jnp.dtype(compute_dtype).itemsize
    sublane = 8 * (4 // in_bytes)             # 8 rows for f32, 16 rows for bf16

    # Pad every feature dim to a lane-dense multiple of 128.
    Dp = _round_up(D, 128)
    Hp = _round_up(H, 128)
    Cp = _round_up(C, 128)

    tb = _pick_tb(B, Dp, Hp, Cp, in_bytes, sublane)
    Bp = _round_up(B, tb)                     # no partial blocks

    # Pre-transpose to (in, out), zero-pad, cast (all folded by XLA under jit).
    xp = jnp.zeros((Bp, Dp), compute_dtype).at[:B, :D].set(x.astype(compute_dtype))
    w1p = jnp.zeros((Dp, Hp), compute_dtype).at[:D, :H].set(w1.T.astype(compute_dtype))
    w2p = jnp.zeros((Hp, Cp), compute_dtype).at[:H, :C].set(w2.T.astype(compute_dtype))
    b1p = jnp.zeros((1, Hp), jnp.float32).at[0, :H].set(b1.astype(jnp.float32))
    b2p = jnp.zeros((1, Cp), jnp.float32).at[0, :C].set(b2.astype(jnp.float32))

    # Explicit scoped-VMEM limit derived from the actual residency (headroom under
    # v7x's 64 MiB physical VMEM; also lifts v5e's 16 MiB scoped default).
    weight_bytes = 2 * ((Dp * Hp + Hp * Cp) * in_bytes + (Hp + Cp) * 4)
    tile_bytes = 2 * tb * Dp * in_bytes + 2 * tb * Cp * 4 + tb * Hp * 4
    vmem_limit = int(min(max(2 * (weight_bytes + tile_bytes), 4 << 20), 40 << 20))

    out_padded = pl.pallas_call(
        mlp_kernel,
        out_shape=jax.ShapeDtypeStruct((Bp, Cp), x.dtype),
        grid_spec=pltpu.PrefetchScalarGridSpec(
            num_scalar_prefetch=0,
            grid=(Bp // tb,),
            in_specs=[
                pl.BlockSpec((tb, Dp), lambda i: (i, 0)),   # x tile over batch
                pl.BlockSpec((Dp, Hp), lambda i: (0, 0)),   # W1 (resident)
                pl.BlockSpec((1, Hp), lambda i: (0, 0)),    # b1
                pl.BlockSpec((Hp, Cp), lambda i: (0, 0)),   # W2 (resident)
                pl.BlockSpec((1, Cp), lambda i: (0, 0)),    # b2
            ],
            out_specs=pl.BlockSpec((tb, Cp), lambda i: (i, 0)),  # lane-dense output
        ),
        compiler_params=pltpu.CompilerParams(
            dimension_semantics=("parallel",),
            vmem_limit_bytes=vmem_limit,
        ),
    )(xp, w1p, b1p, w2p, b2p)

    # Strip the batch/class padding (glue, fused under jit).
    return out_padded[:B, :C]


def mlp_reference(x, w1, b1, w2, b2):
    h = jnp.maximum(x @ w1.T + b1, 0.0)
    return h @ w2.T + b2


if __name__ == "__main__":
    # Small shapes consistent with the module defaults: input_dim=32, hidden=64,
    # num_classes=2, batch=8.
    B, D, H, C = 8, 32, 64, 2

    key = jax.random.PRNGKey(0)
    kx, kw1, kb1, kw2, kb2 = jax.random.split(key, 5)

    # nn.Linear-layout parameters: (out, in) weights, (out,) biases.
    x = jax.random.normal(kx, (B, D), dtype=jnp.float32)
    w1 = jax.random.normal(kw1, (H, D), dtype=jnp.float32) * (1.0 / jnp.sqrt(D))
    b1 = jax.random.normal(kb1, (H,), dtype=jnp.float32) * 0.01
    w2 = jax.random.normal(kw2, (C, H), dtype=jnp.float32) * (1.0 / jnp.sqrt(H))
    b2 = jax.random.normal(kb2, (C,), dtype=jnp.float32) * 0.01

    ref = mlp_reference(x, w1, b1, w2, b2)

    # f32 compute path: exact structural check against the reference.
    out_f32 = mlp_forward(x, w1, b1, w2, b2, compute_dtype=jnp.float32)
    out_f32 = jax.block_until_ready(out_f32)
    assert out_f32.shape == (B, C), out_f32.shape
    assert jnp.allclose(out_f32, ref, atol=1e-5, rtol=1e-5), "f32 mismatch vs reference"

    # bf16 compute path (default / performance config): looser tolerance.
    out_bf16 = mlp_forward(x, w1, b1, w2, b2)
    out_bf16 = jax.block_until_ready(out_bf16)
    assert out_bf16.shape == (B, C), out_bf16.shape
    assert jnp.allclose(out_bf16, ref, atol=1e-1, rtol=1e-1), "bf16 mismatch vs reference"

    print("KERNEL_OK")
</pallas_src>

<mosaic_0001>
module attributes {stable_mosaic.version = 11 : i64} {
  func.func @mlp_kernel(%arg0: i32, %arg1: memref<8x128xf32, #tpu.memory_space<vmem>>, %arg2: memref<128x128xf32, #tpu.memory_space<vmem>>, %arg3: memref<1x128xf32, #tpu.memory_space<vmem>>, %arg4: memref<128x128xf32, #tpu.memory_space<vmem>>, %arg5: memref<1x128xf32, #tpu.memory_space<vmem>>, %arg6: memref<8x128xf32, #tpu.memory_space<vmem>>) attributes {dimension_semantics = [#tpu.dimension_semantics<parallel>], iteration_bounds = array<i64: 1>, scalar_prefetch = 0 : i64, scratch_operands = 0 : i64, tpu.core_type = #tpu.core_type<tc>, window_params = [{transform_indices = @transform_0, window_bounds = array<i64: 8, 128>}, {pipeline_mode = #tpu.pipeline_mode<synchronous>, transform_indices = @transform_1, window_bounds = array<i64: 128, 128>}, {pipeline_mode = #tpu.pipeline_mode<synchronous>, transform_indices = @transform_2, window_bounds = array<i64: 1, 128>}, {pipeline_mode = #tpu.pipeline_mode<synchronous>, transform_indices = @transform_3, window_bounds = array<i64: 128, 128>}, {pipeline_mode = #tpu.pipeline_mode<synchronous>, transform_indices = @transform_4, window_bounds = array<i64: 1, 128>}, {transform_indices = @transform_5, window_bounds = array<i64: 8, 128>}]} {
    %c0 = arith.constant 0 : index
    %c0_0 = arith.constant 0 : index
    %0 = vector.load %arg1[%c0, %c0_0] : memref<8x128xf32, #tpu.memory_space<vmem>>, vector<8x128xf32>
    %c0_1 = arith.constant 0 : index
    %c0_2 = arith.constant 0 : index
    %1 = vector.load %arg2[%c0_1, %c0_2] : memref<128x128xf32, #tpu.memory_space<vmem>>, vector<128x128xf32>
    %cst = arith.constant dense<0.000000e+00> : vector<8x128xf32>
    %2 = tpu.matmul %0, %1, %cst {dimension_numbers = #tpu.dot_dimension_numbers<[1], [0], [0], [1], [0, 0, 1, 1], [], []>} : vector<8x128xf32>, vector<128x128xf32>, vector<8x128xf32> -> vector<8x128xf32>
    %c0_3 = arith.constant 0 : index
    %c0_4 = arith.constant 0 : index
    %3 = vector.load %arg3[%c0_3, %c0_4] : memref<1x128xf32, #tpu.memory_space<vmem>>, vector<1x128xf32>
    %4 = vector.broadcast %3 : vector<1x128xf32> to vector<8x128xf32>
    %5 = arith.addf %2, %4 : vector<8x128xf32>
    %cst_5 = arith.constant 0.000000e+00 : f32
    %6 = vector.broadcast %cst_5 : f32 to vector<8x128xf32>
    %7 = arith.maximumf %5, %6 : vector<8x128xf32>
    %c0_6 = arith.constant 0 : index
    %c0_7 = arith.constant 0 : index
    %8 = vector.load %arg4[%c0_6, %c0_7] : memref<128x128xf32, #tpu.memory_space<vmem>>, vector<128x128xf32>
    %cst_8 = arith.constant dense<0.000000e+00> : vector<8x128xf32>
    %9 = tpu.matmul %7, %8, %cst_8 {dimension_numbers = #tpu.dot_dimension_numbers<[1], [0], [0], [1], [0, 0, 1, 1], [], []>} : vector<8x128xf32>, vector<128x128xf32>, vector<8x128xf32> -> vector<8x128xf32>
    %c0_9 = arith.constant 0 : index
    %c0_10 = arith.constant 0 : index
    %10 = vector.load %arg5[%c0_9, %c0_10] : memref<1x128xf32, #tpu.memory_space<vmem>>, vector<1x128xf32>
    %11 = vector.broadcast %10 : vector<1x128xf32> to vector<8x128xf32>
    %12 = arith.addf %9, %11 : vector<8x128xf32>
    %c0_11 = arith.constant 0 : index
    %c0_12 = arith.constant 0 : index
    %13 = vector.load %arg6[%c0_11, %c0_12] : memref<8x128xf32, #tpu.memory_space<vmem>>, vector<8x128xf32>
    tpu.vector_store %arg6[%c0_11, %c0_12], %12 {strides = array<i32>} : memref<8x128xf32, #tpu.memory_space<vmem>>, vector<8x128xf32>,
    return
  }
  func.func @transform_0(%arg0: i32) -> (i32, i32) {
    %c0_i32 = arith.constant 0 : i32
    %c0_i32_0 = arith.constant 0 : i32
    return %arg0, %c0_i32 : i32, i32
  }
  func.func @transform_1(%arg0: i32) -> (i32, i32) {
    %c0_i32 = arith.constant 0 : i32
    %c0_i32_0 = arith.constant 0 : i32
    %c0_i32_1 = arith.constant 0 : i32
    return %c0_i32, %c0_i32_0 : i32, i32
  }
  func.func @transform_2(%arg0: i32) -> (i32, i32) {
    %c0_i32 = arith.constant 0 : i32
    %c0_i32_0 = arith.constant 0 : i32
    %c0_i32_1 = arith.constant 0 : i32
    return %c0_i32, %c0_i32_0 : i32, i32
  }
  func.func @transform_3(%arg0: i32) -> (i32, i32) {
    %c0_i32 = arith.constant 0 : i32
    %c0_i32_0 = arith.constant 0 : i32
    %c0_i32_1 = arith.constant 0 : i32
    return %c0_i32, %c0_i32_0 : i32, i32
  }
  func.func @transform_4(%arg0: i32) -> (i32, i32) {
    %c0_i32 = arith.constant 0 : i32
    %c0_i32_0 = arith.constant 0 : i32
    %c0_i32_1 = arith.constant 0 : i32
    return %c0_i32, %c0_i32_0 : i32, i32
  }
  func.func @transform_5(%arg0: i32) -> (i32, i32) {
    %c0_i32 = arith.constant 0 : i32
    %c0_i32_0 = arith.constant 0 : i32
    return %arg0, %c0_i32 : i32, i32
  }
}

</mosaic_0001>

<bundles_post_ra>
// kernel: mlp_forward.1
= control target key start
LH: loop header
LB: loop body
LE: loop exit
PB: predicated region body
PF: predicated region fallthrough
CT: control target
= control target key end

     0   :  { %v321_v0 = vmov 0.0   ;;  %vm322_vm0 = vmmov 0   ;;  %s495_s1 = inlined_call_operand.vmem [shape: f32[128,128], index: 1, kind: input, shape index: {}]   ;;  %s496_s3 = inlined_call_operand.vmem [shape: f32[128,128], index: 3, kind: input, shape index: {}]   ;;  %s497_s0 = inlined_call_operand.vmem [shape: f32[8,128], index: 0, kind: input, shape index: {}]   ;;  %s498_s2 = inlined_call_operand.vmem [shape: f32[1,128], index: 2, kind: input, shape index: {}]   ;;  %s499_s4 = inlined_call_operand.vmem [shape: f32[1,128], index: 4, kind: input, shape index: {}]   ;;  %s500_s5 = inlined_call_operand.vmem [shape: f32[8,128], index: 5, kind: output, shape index: {}]  }
   0x1   :  { %249 = vmatprep.subr.mxu0 %v321_v0  ;;  %v36_v1 = vld [vmem:[%s495_s1 + $0x78] sm:$0xff]  ;;  %v35_v2 = vld [vmem:[%s495_s1 + $0x70] sm:$0xff]  ;;  %281 = vmatprep.mubr.msk.f32.mxu0 %vm322_vm0, %v321_v0  ;;  %v34_v3 = vld [vmem:[%s495_s1 + $0x68] sm:$0xff] }
   0x2   :  { %250 = vmatpush3.msra.mxu0 %v36_v1  ;;  %284 = vmatprep.subr.mxu1 %v321_v0  ;;  %v33_v4 = vld [vmem:[%s495_s1 + $0x60] sm:$0xff]  ;;  %v130_v5 = vld [vmem:[%s496_s3 + $0x78] sm:$0xff]  ;;  %v129_v7 = vld [vmem:[%s496_s3 + $0x70] sm:$0xff] }
   0x3   :  { %251 = vmatprep.subr.mxu0 %v321_v0  ;;  %316 = vmatprep.mubr.msk.f32.mxu1 %vm322_vm0, %v321_v0  ;;  %v32_v6 = vld [vmem:[%s495_s1 + $0x58] sm:$0xff]  ;;  %v128_v8 = vld [vmem:[%s496_s3 + $0x68] sm:$0xff]  ;;  %v31_v9 = vld [vmem:[%s495_s1 + $0x50] sm:$0xff] }
   0x4   :  { %252 = vmatpush3.msra.mxu0 %v35_v2  ;;  %285 = vmatpush3.msra.mxu1 %v130_v5  ;;  %v127_v10 = vld [vmem:[%s496_s3 + $0x60] sm:$0xff]  ;;  %v30_v11 = vld [vmem:[%s495_s1 + $0x48] sm:$0xff]  ;;  %v126_v12 = vld [vmem:[%s496_s3 + $0x58] sm:$0xff] }
   0x5   :  { %253 = vmatprep.subr.mxu0 %v321_v0  ;;  %286 = vmatprep.subr.mxu1 %v321_v0  ;;  %v29_v13 = vld [vmem:[%s495_s1 + $0x40] sm:$0xff]  ;;  %v125_v14 = vld [vmem:[%s496_s3 + $0x50] sm:$0xff]  ;;  %v28_v15 = vld [vmem:[%s495_s1 + $0x38] sm:$0xff] }
   0x6   :  { %254 = vmatpush3.msra.mxu0 %v34_v3  ;;  %287 = vmatpush3.msra.mxu1 %v129_v7  ;;  %v124_v16 = vld [vmem:[%s496_s3 + $0x48] sm:$0xff]  ;;  %v27_v17 = vld [vmem:[%s495_s1 + $0x30] sm:$0xff]  ;;  %v123_v18 = vld [vmem:[%s496_s3 + $0x40] sm:$0xff] }
   0x7   :  { %255 = vmatprep.subr.mxu0 %v321_v0  ;;  %288 = vmatprep.subr.mxu1 %v321_v0  ;;  %v26_v19 = vld [vmem:[%s495_s1 + $0x28] sm:$0xff]  ;;  %v122_v20 = vld [vmem:[%s496_s3 + $0x38] sm:$0xff]  ;;  %v25_v21 = vld [vmem:[%s495_s1 + $0x20] sm:$0xff] }
   0x8   :  { %256 = vmatpush3.msra.mxu0 %v33_v4  ;;  %289 = vmatpush3.msra.mxu1 %v128_v8  ;;  %v121_v22 = vld [vmem:[%s496_s3 + $0x30] sm:$0xff]  ;;  %v24_v23 = vld [vmem:[%s495_s1 + $0x18] sm:$0xff]  ;;  %v120_v24 = vld [vmem:[%s496_s3 + $0x28] sm:$0xff] }
   0x9   :  { %257 = vmatprep.subr.mxu0 %v321_v0  ;;  %290 = vmatprep.subr.mxu1 %v321_v0  ;;  %v23_v25 = vld [vmem:[%s495_s1 + $0x10] sm:$0xff]  ;;  %v119_v26 = vld [vmem:[%s496_s3 + $0x20] sm:$0xff]  ;;  %v22_v27 = vld [vmem:[%s495_s1 + $0x8] sm:$0xff] }
   0xa   :  { %258 = vmatpush3.msra.mxu0 %v32_v6  ;;  %291 = vmatpush3.msra.mxu1 %v127_v10  ;;  %v118_v28 = vld [vmem:[%s496_s3 + $0x18] sm:$0xff]  ;;  %v21_v29 = vld [vmem:[%s495_s1] sm:$0xff]  ;;  %v117_v31 = vld [vmem:[%s496_s3 + $0x10] sm:$0xff] }
   0xb   :  { %259 = vmatprep.subr.mxu0 %v321_v0  ;;  %292 = vmatprep.subr.mxu1 %v321_v0  ;;  %v20_v30 = vld [vmem:[%s497_s0] sm:$0xff]  ;;  %v116_v32 = vld [vmem:[%s496_s3 + $0x8] sm:$0xff] }
   0xc   :  { %260 = vmatpush3.msra.mxu0 %v31_v9  ;;  %293 = vmatpush3.msra.mxu1 %v126_v12  ;;  %v115_v33 = vld [vmem:[%s496_s3] sm:$0xff] }
   0xd   :  { %261 = vmatprep.subr.mxu0 %v321_v0  ;;  %294 = vmatprep.subr.mxu1 %v321_v0  ;;  %v213_v34 = vld [vmem:[%s498_s2] ss:$0 sm:$0xff] }
   0xe   :  { %262 = vmatpush3.msra.mxu0 %v30_v11  ;;  %295 = vmatpush3.msra.mxu1 %v125_v14  ;;  %v214_v39 = vld [vmem:[%s499_s4] ss:$0 sm:$0xff] }
   0xf   :  { %263 = vmatprep.subr.mxu0 %v321_v0  ;;  %296 = vmatprep.subr.mxu1 %v321_v0 }
  0x10   :  { %264 = vmatpush3.msra.mxu0 %v29_v13  ;;  %297 = vmatpush3.msra.mxu1 %v124_v16 }
  0x11   :  { %265 = vmatprep.subr.mxu0 %v321_v0  ;;  %298 = vmatprep.subr.mxu1 %v321_v0 }
  0x12   :  { %266 = vmatpush3.msra.mxu0 %v28_v15  ;;  %299 = vmatpush3.msra.mxu1 %v123_v18 }
  0x13   :  { %267 = vmatprep.subr.mxu0 %v321_v0  ;;  %300 = vmatprep.subr.mxu1 %v321_v0 }
  0x14   :  { %268 = vmatpush3.msra.mxu0 %v27_v17  ;;  %301 = vmatpush3.msra.mxu1 %v122_v20 }
  0x15   :  { %269 = vmatprep.subr.mxu0 %v321_v0  ;;  %302 = vmatprep.subr.mxu1 %v321_v0 }
  0x16   :  { %270 = vmatpush3.msra.mxu0 %v26_v19  ;;  %303 = vmatpush3.msra.mxu1 %v121_v22 }
  0x17   :  { %271 = vmatprep.subr.mxu0 %v321_v0  ;;  %304 = vmatprep.subr.mxu1 %v321_v0 }
  0x18   :  { %272 = vmatpush3.msra.mxu0 %v25_v21  ;;  %305 = vmatpush3.msra.mxu1 %v120_v24 }
  0x19   :  { %273 = vmatprep.subr.mxu0 %v321_v0  ;;  %306 = vmatprep.subr.mxu1 %v321_v0 }
  0x1a   :  { %274 = vmatpush3.msra.mxu0 %v24_v23  ;;  %307 = vmatpush3.msra.mxu1 %v119_v26 }
  0x1b   :  { %275 = vmatprep.subr.mxu0 %v321_v0  ;;  %308 = vmatprep.subr.mxu1 %v321_v0 }
  0x1c   :  { %276 = vmatpush3.msra.mxu0 %v23_v25  ;;  %309 = vmatpush3.msra.mxu1 %v118_v28 }
  0x1d   :  { %277 = vmatprep.subr.mxu0 %v321_v0  ;;  %310 = vmatprep.subr.mxu1 %v321_v0 }
  0x1e   :  { %278 = vmatpush3.msra.mxu0 %v22_v27  ;;  %311 = vmatpush3.msra.mxu1 %v117_v31 }
  0x1f   :  { %279 = vmatprep.subr.mxu0 %v321_v0  ;;  %312 = vmatprep.subr.mxu1 %v321_v0 }
  0x20   :  { %280 = vmatpush3.msra.mxu0 %v21_v29  ;;  %313 = vmatpush3.msra.mxu1 %v116_v32 }
  0x21   :  { %282 = vmatmul.mubr.f32.vlgmr.msra.gmra.mxu0 %v20_v30  ;;  %314 = vmatprep.subr.mxu1 %v321_v0 }
  0x22   :  { %315 = vmatpush3.msra.mxu1 %v115_v33 }
  0xe1   :  { %v110_v35 = vpop.f32.mrf.mxu0 }
  0xe2   :  { %v111_v36 = vadd.f32 %v213_v34, %v110_v35 }
  0xe3   :  { %v283_v37 = vpop.f32.mrf.mxu0 }
  0xe4   :  { %v114_v38 = vmax.f32 %v111_v36, 0.0 }
  0xe6   :  { %317 = vmatmul.mubr.f32.vlgmr.msra.gmra.mxu1 %v114_v38 }
 0x1a6   :  { %v204_v40 = vpop.f32.mrf.mxu1 }
 0x1a7   :  { %v205_v41 = vadd.f32 %v214_v39, %v204_v40 }
 0x1a8   :  { %v318_v42 = vpop.f32.mrf.mxu1 }
 0x1a9   :  { %208 = vst [vmem:[%s500_s5] sm:$0xff] %v205_v41 }

</bundles_post_ra>
